<compile_context>
chip_gen: v7x
topology: tpu7x:2x2x1
jax: 0.10.0
libtpu: 0.0.40
codegen_flags: <defaults>
</compile_context>

<pallas_src>
import functools

import jax
import jax.numpy as jnp
import numpy as np
from jax.experimental import pallas as pl
from jax.experimental.pallas import tpu as pltpu

_LANE = 128
_SUB = 8
_MAX_TILE_ROWS = 2048  # (2048,128) f32 block = 1 MiB; safe on v5e/v6e/v7x VMEM


def _round_up(x, m):
    return -(-x // m) * m


def _choose_tiling(n):
    """Return (padded_rows, tile_rows) for a flat length-n tensor."""
    rows = _round_up(max(n, 1), _LANE) // _LANE
    rows8 = _round_up(rows, _SUB)
    if rows8 <= _MAX_TILE_ROWS:
        return rows8, rows8                      # single block
    tr = _MAX_TILE_ROWS
    while tr > 256 and rows8 % tr:               # find an exact divisor -> no pad
        tr -= _SUB
    if rows8 % tr == 0:
        return rows8, tr
    # TODO(synk): fully pad-free tail handling via in-kernel masking; for now
    # fall back to padding up to a multiple of the max tile.
    tr = _MAX_TILE_ROWS
    return _round_up(rows8, tr), tr


def _bce_partial_kernel(x_ref, y_ref, acc_ref):
    """Accumulate masked BCE partial sums into a resident (4,8,128) accumulator.

    acc rows: 0 = sum(loss_pos), 1 = sum(loss_total), 2 = num_pos, 3 = num_valid
    """
    @pl.when(pl.program_id(1) == 0)
    def _():
        acc_ref[...] = jnp.zeros_like(acc_ref)

    x = x_ref[...].astype(jnp.float32)           # logits  (tr, 128)
    y = y_ref[...].astype(jnp.float32)           # labels  (tr, 128)

    valid = (y <= 1.1).astype(jnp.float32)       # torch.le(label, 1.1)
    pos = (y >= 0.5).astype(jnp.float32)         # torch.ge(masked_label, 0.5)
    gt0 = (x >= 0.0).astype(jnp.float32)         # torch.ge(masked_output, 0)

    # stable BCE-with-logits term (same formula as the PyTorch module)
    loss_val = x * (pos - gt0) - jnp.log(1.0 + jnp.exp(x - 2.0 * x * gt0))

    t = -(valid * loss_val)                      # masked total loss per element
    lp = pos * t                                 # masked positive loss

    tr = x.shape[0]

    def part(v):                                 # (tr,128) -> (8,128) vreg adds
        return jnp.sum(v.reshape(tr // _SUB, _SUB, _LANE), axis=0)

    acc_ref[0] += part(lp)
    acc_ref[1] += part(t)
    acc_ref[2] += part(valid * pos)
    acc_ref[3] += part(valid)


def _masked_partial_sums(out_flat, lbl_flat):
    n = out_flat.shape[0]
    rows_p, tr = _choose_tiling(n)
    total = rows_p * _LANE

    if total != n:  # pad only when the flat size doesn't tile cleanly
        pad = total - n
        out_flat = jnp.pad(out_flat, (0, pad))                       # logits -> 0
        lbl_flat = jnp.pad(lbl_flat, (0, pad), constant_values=2)    # > 1.1 -> ignored

    out2d = out_flat.reshape(rows_p, _LANE)
    lbl2d = lbl_flat.reshape(rows_p, _LANE)

    num_blocks = rows_p // tr
    # TODO(synk): query actual TensorCore count; 2-way split is harmless on 1-TC chips.
    ncores = 2
    P = ncores if (num_blocks >= ncores and num_blocks % ncores == 0) else 1
    steps = num_blocks // P

    sums = pl.pallas_call(
        _bce_partial_kernel,
        out_shape=jax.ShapeDtypeStruct((P * 4, _SUB, _LANE), jnp.float32),
        grid=(P, steps),
        in_specs=[
            pl.BlockSpec((tr, _LANE), lambda p, j: (p * steps + j, 0)),
            pl.BlockSpec((tr, _LANE), lambda p, j: (p * steps + j, 0)),
        ],
        out_specs=pl.BlockSpec((4, _SUB, _LANE), lambda p, j: (p, 0, 0)),
        compiler_params=pltpu.CompilerParams(
            dimension_semantics=("parallel", "arbitrary")),
    )(out2d, lbl2d)

    parts = jnp.sum(sums.reshape(P, 4, _SUB, _LANE), axis=(0, 2, 3))
    # loss_pos, loss_total, num_pos, num_valid
    return parts[0], parts[1], parts[2], parts[3]


@functools.partial(jax.jit, static_argnames=("average", "positive_weight"))
def bce_with_logits_loss_weighted(output, label, *, average="over_size",
                                  positive_weight=None):
    """Matches BCEWithLogitsLossWeighted.forward (reduction='mean')."""
    out_sq = jnp.squeeze(output)
    lbl_sq = jnp.squeeze(label)
    assert out_sq.shape == lbl_sq.shape
    if lbl_sq.dtype == jnp.bool_:
        lbl_sq = lbl_sq.astype(jnp.float32)

    loss_pos, loss_total, num_pos, num_valid = _masked_partial_sums(
        out_sq.reshape(-1), lbl_sq.reshape(-1))

    loss_neg = loss_total - loss_pos
    num_neg = num_valid - num_pos

    if positive_weight is None:
        w = num_neg / num_valid                  # NaN if every label is ignored,
    else:                                        # mirroring the PyTorch module.
        w = jnp.float32(positive_weight)

    final_loss = w * loss_pos + (1.0 - w) * loss_neg

    if average == "over_size":
        final_loss = final_loss / num_valid
    elif average == "over_batch":
        # Matches the PyTorch module: divides by the *squeezed* label's dim 0.
        final_loss = final_loss / jnp.float32(lbl_sq.shape[0])
    else:
        raise NotImplementedError
    return final_loss


def _reference_numpy(output, label, positive_weight=None):
    """Pure numpy (float64) mirror of the PyTorch module for verification."""
    out = np.squeeze(np.asarray(output).astype(np.float64))
    lbl = np.squeeze(np.asarray(label).astype(np.float64))
    mask = lbl <= 1.1
    mo = out[mask]
    ml = (lbl[mask] >= 0.5).astype(np.float64)
    if positive_weight is None:
        w = np.sum(1.0 - ml) / ml.size
    else:
        w = float(positive_weight)
    gt0 = (mo >= 0.0).astype(np.float64)
    loss_val = mo * (ml - gt0) - np.log(1.0 + np.exp(mo - 2.0 * mo * gt0))
    loss_pos = np.sum(-ml * loss_val)
    loss_neg = np.sum(-(1.0 - ml) * loss_val)
    final = w * loss_pos + (1.0 - w) * loss_neg
    return final / float(ml.size)


if __name__ == "__main__":
    key = jax.random.PRNGKey(0)
    k1, k2, k3, k4, k5, k6 = jax.random.split(key, 6)

    # --- small check (NCHW with singleton channel, as the module implies) ---
    shape = (2, 1, 16, 16)
    logits = jax.random.normal(k1, shape, dtype=jnp.float32) * 2.0
    labels = (jax.random.uniform(k2, shape) > 0.5).astype(jnp.float32)
    ignore = jax.random.uniform(k3, shape) > 0.9          # label 255 -> ignored
    labels = jnp.where(ignore, jnp.float32(255.0), labels)

    loss = jax.block_until_ready(bce_with_logits_loss_weighted(logits, labels))
    np.testing.assert_allclose(np.asarray(loss), _reference_numpy(logits, labels),
                               rtol=1e-5, atol=1e-6)

    loss_w = jax.block_until_ready(
        bce_with_logits_loss_weighted(logits, labels, positive_weight=0.3))
    np.testing.assert_allclose(
        np.asarray(loss_w), _reference_numpy(logits, labels, positive_weight=0.3),
        rtol=1e-5, atol=1e-6)

    # --- medium check: multi-block grid, 2-way parallel axis, bf16 logits ---
    shape2 = (4, 1, 512, 512)
    logits2 = (jax.random.normal(k4, shape2, dtype=jnp.float32) * 2.0
               ).astype(jnp.bfloat16)
    labels2 = (jax.random.uniform(k5, shape2) > 0.5).astype(jnp.float32)
    ignore2 = jax.random.uniform(k6, shape2) > 0.9
    labels2 = jnp.where(ignore2, jnp.float32(255.0), labels2)

    loss2 = jax.block_until_ready(bce_with_logits_loss_weighted(logits2, labels2))
    ref2 = _reference_numpy(logits2.astype(jnp.float32), labels2)
    np.testing.assert_allclose(np.asarray(loss2), ref2, rtol=1e-4, atol=1e-5)

    print("KERNEL_OK")
</pallas_src>

<mosaic_0001>
module attributes {stable_mosaic.version = 11 : i64} {
  func.func @_bce_partial_kernel(%arg0: i32, %arg1: i32, %arg2: memref<8x128xf32, #tpu.memory_space<vmem>>, %arg3: memref<8x128xf32, #tpu.memory_space<vmem>>, %arg4: memref<4x8x128xf32, #tpu.memory_space<vmem>>) attributes {dimension_semantics = [#tpu.dimension_semantics<parallel>, #tpu.dimension_semantics<arbitrary>], iteration_bounds = array<i64: 1, 1>, scalar_prefetch = 0 : i64, scratch_operands = 0 : i64, tpu.core_type = #tpu.core_type<tc>, window_params = [{transform_indices = @transform_0, window_bounds = array<i64: 8, 128>}, {transform_indices = @transform_1, window_bounds = array<i64: 8, 128>}, {transform_indices = @transform_2, window_bounds = array<i64: 4, 8, 128>}]} {
    %c0_i32 = arith.constant 0 : i32
    %0 = arith.cmpi eq, %arg1, %c0_i32 : i32
    %1 = arith.extui %0 : i1 to i32
    %c0_i32_0 = arith.constant 0 : i32
    %2 = arith.cmpi ne, %1, %c0_i32_0 : i32
    scf.if %2 {
      %cst_34 = arith.constant 0.000000e+00 : f32
      %65 = vector.broadcast %cst_34 : f32 to vector<4x8x128xf32>
      %c0_35 = arith.constant 0 : index
      %c0_36 = arith.constant 0 : index
      %c0_37 = arith.constant 0 : index
      %66 = vector.load %arg4[%c0_35, %c0_36, %c0_37] : memref<4x8x128xf32, #tpu.memory_space<vmem>>, vector<4x8x128xf32>
      tpu.vector_store %arg4[%c0_35, %c0_36, %c0_37], %65 {strides = array<i32>} : memref<4x8x128xf32, #tpu.memory_space<vmem>>, vector<4x8x128xf32>,
    } else {
    }
    %c0 = arith.constant 0 : index
    %c0_1 = arith.constant 0 : index
    %3 = vector.load %arg2[%c0, %c0_1] : memref<8x128xf32, #tpu.memory_space<vmem>>, vector<8x128xf32>
    %c0_2 = arith.constant 0 : index
    %c0_3 = arith.constant 0 : index
    %4 = vector.load %arg3[%c0_2, %c0_3] : memref<8x128xf32, #tpu.memory_space<vmem>>, vector<8x128xf32>
    %cst = arith.constant 1.100000e+00 : f32
    %5 = vector.broadcast %cst : f32 to vector<8x128xf32>
    %6 = arith.cmpf ole, %4, %5 : vector<8x128xf32>
    %7 = arith.extui %6 : vector<8x128xi1> to vector<8x128xi32>
    %8 = arith.sitofp %7 : vector<8x128xi32> to vector<8x128xf32>
    %cst_4 = arith.constant 5.000000e-01 : f32
    %9 = vector.broadcast %cst_4 : f32 to vector<8x128xf32>
    %10 = arith.cmpf oge, %4, %9 : vector<8x128xf32>
    %11 = arith.extui %10 : vector<8x128xi1> to vector<8x128xi32>
    %12 = arith.sitofp %11 : vector<8x128xi32> to vector<8x128xf32>
    %cst_5 = arith.constant 0.000000e+00 : f32
    %13 = vector.broadcast %cst_5 : f32 to vector<8x128xf32>
    %14 = arith.cmpf oge, %3, %13 : vector<8x128xf32>
    %15 = arith.extui %14 : vector<8x128xi1> to vector<8x128xi32>
    %16 = arith.sitofp %15 : vector<8x128xi32> to vector<8x128xf32>
    %17 = arith.subf %12, %16 : vector<8x128xf32>
    %18 = arith.mulf %3, %17 : vector<8x128xf32>
    %cst_6 = arith.constant 2.000000e+00 : f32
    %19 = vector.broadcast %cst_6 : f32 to vector<8x128xf32>
    %20 = arith.mulf %19, %3 : vector<8x128xf32>
    %21 = arith.mulf %20, %16 : vector<8x128xf32>
    %22 = arith.subf %3, %21 : vector<8x128xf32>
    %23 = math.exp %22 : vector<8x128xf32>
    %cst_7 = arith.constant 1.000000e+00 : f32
    %24 = vector.broadcast %cst_7 : f32 to vector<8x128xf32>
    %25 = arith.addf %24, %23 : vector<8x128xf32>
    %26 = math.log %25 : vector<8x128xf32>
    %27 = arith.subf %18, %26 : vector<8x128xf32>
    %28 = arith.mulf %8, %27 : vector<8x128xf32>
    %cst_8 = arith.constant 0.000000e+00 : f32
    %29 = vector.broadcast %cst_8 : f32 to vector<8x128xf32>
    %30 = arith.subf %29, %28 : vector<8x128xf32>
    %31 = arith.mulf %12, %30 : vector<8x128xf32>
    %c0_9 = arith.constant 0 : index
    %c0_10 = arith.constant 0 : index
    %c0_11 = arith.constant 0 : index
    %32 = vector.load %arg4[%c0_9, %c0_10, %c0_11] : memref<4x8x128xf32, #tpu.memory_space<vmem>>, vector<1x8x128xf32>
    %33 = vector.shape_cast %32 : vector<1x8x128xf32> to vector<8x128xf32>
    %34 = vector.shape_cast %31 : vector<8x128xf32> to vector<1x8x128xf32>
    %cst_12 = arith.constant dense<0.000000e+00> : vector<8x128xf32>
    %35 = vector.multi_reduction <add>, %34, %cst_12 [0] : vector<1x8x128xf32> to vector<8x128xf32>
    %36 = arith.addf %33, %35 : vector<8x128xf32>
    %c0_13 = arith.constant 0 : index
    %c0_14 = arith.constant 0 : index
    %c0_15 = arith.constant 0 : index
    %37 = vector.load %arg4[%c0_13, %c0_14, %c0_15] : memref<4x8x128xf32, #tpu.memory_space<vmem>>, vector<1x8x128xf32>
    %38 = vector.shape_cast %37 : vector<1x8x128xf32> to vector<8x128xf32>
    %39 = vector.shape_cast %36 : vector<8x128xf32> to vector<1x8x128xf32>
    tpu.vector_store %arg4[%c0_13, %c0_14, %c0_15], %39 {strides = array<i32>} : memref<4x8x128xf32, #tpu.memory_space<vmem>>, vector<1x8x128xf32>,
    %c1 = arith.constant 1 : index
    %c0_16 = arith.constant 0 : index
    %c0_17 = arith.constant 0 : index
    %40 = vector.load %arg4[%c1, %c0_16, %c0_17] : memref<4x8x128xf32, #tpu.memory_space<vmem>>, vector<1x8x128xf32>
    %41 = vector.shape_cast %40 : vector<1x8x128xf32> to vector<8x128xf32>
    %42 = vector.shape_cast %30 : vector<8x128xf32> to vector<1x8x128xf32>
    %cst_18 = arith.constant dense<0.000000e+00> : vector<8x128xf32>
    %43 = vector.multi_reduction <add>, %42, %cst_18 [0] : vector<1x8x128xf32> to vector<8x128xf32>
    %44 = arith.addf %41, %43 : vector<8x128xf32>
    %c1_19 = arith.constant 1 : index
    %c0_20 = arith.constant 0 : index
    %c0_21 = arith.constant 0 : index
    %45 = vector.load %arg4[%c1_19, %c0_20, %c0_21] : memref<4x8x128xf32, #tpu.memory_space<vmem>>, vector<1x8x128xf32>
    %46 = vector.shape_cast %45 : vector<1x8x128xf32> to vector<8x128xf32>
    %47 = vector.shape_cast %44 : vector<8x128xf32> to vector<1x8x128xf32>
    tpu.vector_store %arg4[%c1_19, %c0_20, %c0_21], %47 {strides = array<i32>} : memref<4x8x128xf32, #tpu.memory_space<vmem>>, vector<1x8x128xf32>,
    %c2 = arith.constant 2 : index
    %c0_22 = arith.constant 0 : index
    %c0_23 = arith.constant 0 : index
    %48 = vector.load %arg4[%c2, %c0_22, %c0_23] : memref<4x8x128xf32, #tpu.memory_space<vmem>>, vector<1x8x128xf32>
    %49 = vector.shape_cast %48 : vector<1x8x128xf32> to vector<8x128xf32>
    %50 = arith.mulf %8, %12 : vector<8x128xf32>
    %51 = vector.shape_cast %50 : vector<8x128xf32> to vector<1x8x128xf32>
    %cst_24 = arith.constant dense<0.000000e+00> : vector<8x128xf32>
    %52 = vector.multi_reduction <add>, %51, %cst_24 [0] : vector<1x8x128xf32> to vector<8x128xf32>
    %53 = arith.addf %49, %52 : vector<8x128xf32>
    %c2_25 = arith.constant 2 : index
    %c0_26 = arith.constant 0 : index
    %c0_27 = arith.constant 0 : index
    %54 = vector.load %arg4[%c2_25, %c0_26, %c0_27] : memref<4x8x128xf32, #tpu.memory_space<vmem>>, vector<1x8x128xf32>
    %55 = vector.shape_cast %54 : vector<1x8x128xf32> to vector<8x128xf32>
    %56 = vector.shape_cast %53 : vector<8x128xf32> to vector<1x8x128xf32>
    tpu.vector_store %arg4[%c2_25, %c0_26, %c0_27], %56 {strides = array<i32>} : memref<4x8x128xf32, #tpu.memory_space<vmem>>, vector<1x8x128xf32>,
    %c3 = arith.constant 3 : index
    %c0_28 = arith.constant 0 : index
    %c0_29 = arith.constant 0 : index
    %57 = vector.load %arg4[%c3, %c0_28, %c0_29] : memref<4x8x128xf32, #tpu.memory_space<vmem>>, vector<1x8x128xf32>
    %58 = vector.shape_cast %57 : vector<1x8x128xf32> to vector<8x128xf32>
    %59 = vector.shape_cast %8 : vector<8x128xf32> to vector<1x8x128xf32>
    %cst_30 = arith.constant dense<0.000000e+00> : vector<8x128xf32>
    %60 = vector.multi_reduction <add>, %59, %cst_30 [0] : vector<1x8x128xf32> to vector<8x128xf32>
    %61 = arith.addf %58, %60 : vector<8x128xf32>
    %c3_31 = arith.constant 3 : index
    %c0_32 = arith.constant 0 : index
    %c0_33 = arith.constant 0 : index
    %62 = vector.load %arg4[%c3_31, %c0_32, %c0_33] : memref<4x8x128xf32, #tpu.memory_space<vmem>>, vector<1x8x128xf32>
    %63 = vector.shape_cast %62 : vector<1x8x128xf32> to vector<8x128xf32>
    %64 = vector.shape_cast %61 : vector<8x128xf32> to vector<1x8x128xf32>
    tpu.vector_store %arg4[%c3_31, %c0_32, %c0_33], %64 {strides = array<i32>} : memref<4x8x128xf32, #tpu.memory_space<vmem>>, vector<1x8x128xf32>,
    return
  }
  func.func @transform_0(%arg0: i32, %arg1: i32) -> (i32, i32) {
    %c1_i32 = arith.constant 1 : i32
    %0 = arith.muli %arg0, %c1_i32 : i32
    %1 = arith.addi %0, %arg1 : i32
    %c0_i32 = arith.constant 0 : i32
    %c0_i32_0 = arith.constant 0 : i32
    return %1, %c0_i32 : i32, i32
  }
  func.func @transform_1(%arg0: i32, %arg1: i32) -> (i32, i32) {
    %c1_i32 = arith.constant 1 : i32
    %0 = arith.muli %arg0, %c1_i32 : i32
    %1 = arith.addi %0, %arg1 : i32
    %c0_i32 = arith.constant 0 : i32
    %c0_i32_0 = arith.constant 0 : i32
    return %1, %c0_i32 : i32, i32
  }
  func.func @transform_2(%arg0: i32, %arg1: i32) -> (i32, i32, i32) {
    %c0_i32 = arith.constant 0 : i32
    %c0_i32_0 = arith.constant 0 : i32
    %c0_i32_1 = arith.constant 0 : i32
    return %arg0, %c0_i32, %c0_i32_0 : i32, i32, i32
  }
}

</mosaic_0001>

<bundles_post_ra>
// kernel: squeeze.7
= control target key start
LH: loop header
LB: loop body
LE: loop exit
PB: predicated region body
PF: predicated region fallthrough
CT: control target
= control target key end

     0   :  { %s67_s8 = smov 112   ;;  %s68_s11 = smov 80   ;;  %vm3_vm0 = vcmask 130048   ;;  %vm9_vm1 = vcmask 1048448   ;;  %vm15_vm2 = vcmask 917248   ;;  %vm21_vm3 = vcmask 786048   ;;  %s111_s0 = inlined_call_operand.vmem [shape: f32[2,1,16,16], index: 0, kind: input, shape index: {}]   ;;  %s112_s1 = inlined_call_operand.vmem [shape: f32[512], index: 1, kind: output, shape index: {}]  }
   0x1   :  { %v53_v0 = vld [vmem:[%s111_s0 + $0x7] ss:$8 sm:$0xf]   ;;  %v55_v1 = vld [vmem:[%s111_s0 + $0x5] ss:$8 sm:$0xf]  }
   0x2   :  { %7 = vrot.lane.b32.xlu0 %v53_v0, %s67_s8  ;;  %19 = vrot.lane.b32.xlu1 %v55_v1, %s68_s11  ;;  %v54_v2 = vld [vmem:[%s111_s0 + $0x6] ss:$8 sm:$0xf]   ;;  %v56_v3 = vld [vmem:[%s111_s0 + $0x4] ss:$8 sm:$0xf]  }
   0x3   :  { %s69_s16 = smov 96   ;;  %v2_v4 = vld [vmem:[%s111_s0] ss:$8 sm:$0xf]   ;;  %s70_s19 = smov 64   ;;  %vm27_vm4 = vcmask 654848  }
   0x4   :  { %v57_v5 = vld [vmem:[%s111_s0 + $0x3] ss:$8 sm:$0xf]   ;;  %4 = vst.msk [vmem:[#allocation0] sm:$0xf] %vm3_vm0, %v2_v4   ;;  %s71_s24 = smov 48  }
   0x5   :  { %v58_v6 = vld [vmem:[%s111_s0 + $0x2] ss:$8 sm:$0xf]   ;;  %s72_s25 = smov 32   ;;  %vm33_vm5 = vcmask 523648   ;;  %vm39_vm6 = vcmask 392448  }
   0x6   :  { %13 = vrot.lane.b32.xlu0 %v54_v2, %s69_s16  ;;  %25 = vrot.lane.b32.xlu1 %v56_v3, %s70_s19  ;;  %v59_v7 = vld [vmem:[%s111_s0 + $0x1] ss:$8 sm:$0xf]   ;;  %s73_s0 = smov 16   ;;  %vm45_vm7 = vcmask 261248  }
   0xa   :  { %31 = vrot.lane.b32.xlu0 %v57_v5, %s71_s24  ;;  %37 = vrot.lane.b32.xlu1 %v58_v6, %s72_s25 }
   0xe   :  { %43 = vrot.lane.b32.xlu0 %v59_v7, %s73_s0 }
  0x74   :  { %v8_v8 = vpop.permute.xlu0 %7   ;;  %v20_v9 = vpop.permute.xlu1 %19  }
  0x75   :  { %10 = vst.msk [vmem:[#allocation0] sm:$0xf] %vm9_vm1, %v8_v8  }
  0x78   :  { %v14_v10 = vpop.permute.xlu0 %13   ;;  %v26_v11 = vpop.permute.xlu1 %25  }
  0x79   :  { %16 = vst.msk [vmem:[#allocation0] sm:$0xf] %vm15_vm2, %v14_v10  }
  0x7a   :  { %22 = vst.msk [vmem:[#allocation0] sm:$0xf] %vm21_vm3, %v20_v9  }
  0x7b   :  { %28 = vst.msk [vmem:[#allocation0] sm:$0xf] %vm27_vm4, %v26_v11  }
  0x7c   :  { %v32_v12 = vpop.permute.xlu0 %31   ;;  %v38_v13 = vpop.permute.xlu1 %37  }
  0x7d   :  { %34 = vst.msk [vmem:[#allocation0] sm:$0xf] %vm33_vm5, %v32_v12  }
  0x7e   :  { %40 = vst.msk [vmem:[#allocation0] sm:$0xf] %vm39_vm6, %v38_v13  }
  0x80   :  { %v44_v14 = vpop.permute.xlu0 %43  }
  0x81   :  { %46 = vst.msk [vmem:[#allocation0] sm:$0xf] %vm45_vm7, %v44_v14  }
  0x88   :  { %v50_v15 = vld [vmem:[#allocation0] sm:$0xf] }
  0x89   :  { %52 = vst [vmem:[%s112_s1] sm:$0xf] %v50_v15 }

// kernel: squeeze.6
= control target key start
LH: loop header
LB: loop body
LE: loop exit
PB: predicated region body
PF: predicated region fallthrough
CT: control target
= control target key end

     0   :  { %2 = vsyncpa [#allocation1], 0  ;;  %s96_s6 = smov [#allocation0]   ;;  %s129_s0 = inlined_call_operand.hbm [shape: f32[2,1,16,16], index: 0, kind: input, shape index: {}]   ;;  %s130_s1 = inlined_call_operand.vmem [shape: f32[512], index: 1, kind: output, shape index: {}]  }
   0x1   :  { %s7_s7 = sshll.u32 %s96_s6, 4  ;;  %s72_s10 = scalar_lea.hbm %s129_s0, 512  ;;  %s8_s7 = int_to_ptr.vmem [resolvable:$true] %s7_s7 }
   0x2   :  { %p73_p0 = scmp.ne.s32.totalorder %s129_s0, %s72_s10  ;;  %p76_p1 = scmp.lt.u32.totalorder %s72_s10, %s129_s0 }
   0x4   :  { %p78_p2 = pnand %p76_p1, %p73_p0 }
   0x6   :  { %81 = shalt.err (!%p78_p2)
}
   0x7   :  { %s82_s15 = scalar_lea.vmem %s8_s7, 512  ;;  %p87_p4 = scmp.lt.s32.totalorder %s8_s7, %s8_s7 }
   0x8   :  { %p83_p3 = scmp.ne.s32.totalorder %s8_s7, %s82_s15  ;;  %p88_p5 = scmp.lt.s32.totalorder %s82_s15, %s82_s15 }
   0xa   :  { %p89_p6 = por %p88_p5, %p87_p4 }
   0xc   :  { %p90_p7 = pnand %p89_p6, %p83_p3 }
   0xe   :  { %93 = shalt.err (!%p90_p7)
}
   0xf   :  { %10 = dma.hbm_to_vmem [thread:$0]  %s129_s0, 512, %s8_s7, [#allocation1]  }
  0x10   :  { %94 = dma.done.wait [#allocation1], 512  }
  0x11   :  { %95 = vsyncadd [#allocation1], 4294966784  ;;  %v16_v0 = vld [vmem:[#allocation0 + $0x7] ss:$8 sm:$0xf]   ;;  %s97_s0 = smov 112  }
  0x12   :  { %v28_v1 = vld [vmem:[#allocation0 + $0x5] ss:$8 sm:$0xf]   ;;  %17 = vrot.lane.b32.xlu0 %v16_v0, %s97_s0  ;;  %s98_s18 = smov 80   ;;  %vm13_vm0 = vcmask 130048   ;;  %s99_s19 = smov 96  }
  0x13   :  { %29 = vrot.lane.b32.xlu1 %v28_v1, %s98_s18  ;;  %v22_v2 = vld [vmem:[#allocation0 + $0x6] ss:$8 sm:$0xf]   ;;  %v34_v3 = vld [vmem:[#allocation0 + $0x4] ss:$8 sm:$0xf]  }
  0x14   :  { %v12_v4 = vld [vmem:[#allocation0] ss:$8 sm:$0xf]   ;;  %s100_s20 = smov 64   ;;  %s101_s21 = smov 48   ;;  %vm19_vm1 = vcmask 1048448  }
  0x15   :  { %14 = vst.msk [vmem:[#allocation2] sm:$0xf] %vm13_vm0, %v12_v4   ;;  %v40_v5 = vld [vmem:[#allocation0 + $0x3] ss:$8 sm:$0xf]   ;;  %s102_s22 = smov 32  }
  0x16   :  { %23 = vrot.lane.b32.xlu0 %v22_v2, %s99_s19  ;;  %v46_v6 = vld [vmem:[#allocation0 + $0x2] ss:$8 sm:$0xf]   ;;  %v52_v7 = vld [vmem:[#allocation0 + $0x1] ss:$8 sm:$0xf]  }
  0x17   :  { %35 = vrot.lane.b32.xlu1 %v34_v3, %s100_s20  ;;  %s103_s23 = smov 16   ;;  %vm25_vm2 = vcmask 917248   ;;  %vm31_vm3 = vcmask 786048   ;;  %vm37_vm4 = vcmask 654848   ;;  %vm43_vm5 = vcmask 523648  }
  0x18   :  { %vm49_vm6 = vcmask 392448   ;;  %vm55_vm7 = vcmask 261248  }
  0x1a   :  { %41 = vrot.lane.b32.xlu0 %v40_v5, %s101_s21 }
  0x1b   :  { %47 = vrot.lane.b32.xlu1 %v46_v6, %s102_s22 }
  0x1e   :  { %53 = vrot.lane.b32.xlu0 %v52_v7, %s103_s23 }
  0x84   :  { %v18_v8 = vpop.permute.xlu0 %17  }
  0x85   :  { %v30_v9 = vpop.permute.xlu1 %29   ;;  %20 = vst.msk [vmem:[#allocation2] sm:$0xf] %vm19_vm1, %v18_v8  }
  0x88   :  { %v24_v10 = vpop.permute.xlu0 %23  }
  0x89   :  { %v36_v11 = vpop.permute.xlu1 %35   ;;  %26 = vst.msk [vmem:[#allocation2] sm:$0xf] %vm25_vm2, %v24_v10  }
  0x8a   :  { %32 = vst.msk [vmem:[#allocation2] sm:$0xf] %vm31_vm3, %v30_v9  }
  0x8b   :  { %38 = vst.msk [vmem:[#allocation2] sm:$0xf] %vm37_vm4, %v36_v11  }
  0x8c   :  { %v42_v12 = vpop.permute.xlu0 %41  }
  0x8d   :  { %v48_v13 = vpop.permute.xlu1 %47   ;;  %44 = vst.msk [vmem:[#allocation2] sm:$0xf] %vm43_vm5, %v42_v12  }
  0x8e   :  { %50 = vst.msk [vmem:[#allocation2] sm:$0xf] %vm49_vm6, %v48_v13  }
  0x90   :  { %v54_v14 = vpop.permute.xlu0 %53  }
  0x91   :  { %56 = vst.msk [vmem:[#allocation2] sm:$0xf] %vm55_vm7, %v54_v14  }
  0x98   :  { %v60_v15 = vld [vmem:[#allocation2] sm:$0xf] }
  0x99   :  { %62 = vst [vmem:[%s130_s1] sm:$0xf] %v60_v15 }
  0x9a   :  { %63 = vsyncpa [#allocation1], 1 }

// kernel: bce_with_logits_loss_weighted.1
= control target key start
LH: loop header
LB: loop body
LE: loop exit
PB: predicated region body
PF: predicated region fallthrough
CT: control target
= control target key end

     0   :  { %v128_v3 = vmov 0.0   ;;  %s162_s0 = inlined_call_operand.vmem [shape: f32[8,128], index: 0, kind: input, shape index: {}]   ;;  %s163_s1 = inlined_call_operand.vmem [shape: f32[8,128], index: 1, kind: input, shape index: {}]   ;;  %s164_s2 = inlined_call_operand.vmem [shape: f32[4,8,128], index: 2, kind: output, shape index: {}]  }
   0x1   :  { %v53_v0 = vld [vmem:[%s162_s0] sm:$0xff] }
   0x2   :  { %v54_v1 = vld [vmem:[%s163_s1] sm:$0xff]  ;;  %vm61_vm2 = vcmp.ge.f32.partialorder %v53_v0, 0.0  ;;  %v66_v2 = vmul.f32 2.0, %v53_v0 }
   0x3   :  { %vm55_vm0 = vcmp.le.f32.partialorder %v54_v1, 1.1  ;;  %vm58_vm1 = vcmp.ge.f32.partialorder %v54_v1, 0.5  ;;  %v116_v6 = vsel %vm61_vm2, 1.0, %v128_v3 }
   0x4   :  { %v114_v4 = vsel %vm55_vm0, 1.0, %v128_v3  ;;  %v115_v5 = vsel %vm58_vm1, 1.0, %v128_v3  ;;  %v67_v7 = vmul.f32 %v116_v6, %v66_v2 }
   0x5   :  { %v89_v8 = vmul.f32 %v115_v5, %v114_v4  ;;  %122 = vst [vmem:[%s164_s2 + $0x18] sm:$0xff] %v114_v4  ;;  %v64_v13 = vsub.f32 %v115_v5, %v116_v6 }
   0x6   :  { %v68_v9 = vsub.f32 %v53_v0, %v67_v7 }
   0x7   :  { %120 = vst [vmem:[%s164_s2 + $0x10] sm:$0xff] %v89_v8  ;;  %v65_v14 = vmul.f32 %v64_v13, %v53_v0 }
   0x8   :  { %v69_v10 = vmul.f32 1.442695, %v68_v9 }
   0xa   :  { %124 = vpow2.f32 %v69_v10 }
  0x14   :  { %v125_v11 = vpop.eup %124 }
  0x15   :  { %v71_v12 = vadd.f32 1.0, %v125_v11 }
  0x17   :  { %126 = vlog2.f32 %v71_v12 }
  0x21   :  { %v127_v15 = vpop.eup %126 }
  0x22   :  { %v73_v16 = vmul.f32 0.6931472, %v127_v15 }
  0x24   :  { %v74_v17 = vsub.f32 %v65_v14, %v73_v16 }
  0x26   :  { %v75_v18 = vmul.f32 %v114_v4, %v74_v17 }
  0x28   :  { %v76_v19 = vsub.f32 0.0, %v75_v18 }
  0x2a   :  { %v77_v20 = vmul.f32 %v115_v5, %v76_v19  ;;  %118 = vst [vmem:[%s164_s2 + $0x8] sm:$0xff] %v76_v19 }
  0x2c   :  { %81 = vst [vmem:[%s164_s2] sm:$0xff] %v77_v20 }

</bundles_post_ra>
